<compile_context>
chip_gen: v7x
topology: tpu7x:2x2x1
jax: 0.10.0
libtpu: 0.0.40
codegen_flags: <defaults>
</compile_context>

<pallas_src>
import math

import jax
import jax.numpy as jnp
from jax.experimental import pallas as pl
from jax.experimental.pallas import tpu as pltpu

LAYERS = [2, 20, 20, 20, 20, 2]
NLAYERS = len(LAYERS) - 1          # 5 linear layers
HID = 20                           # hidden width; all layers padded into HIDxHID
MAX_TILE_N = 2048                  # upper bound on the lane (batch) tile


def _round_up(a: int, m: int) -> int:
    return ((a + m - 1) // m) * m


def _choose_tile_n(n: int) -> int:
    """Batch tile on the lane axis: multiple of 128, <= MAX_TILE_N, and chosen
    so the grid has >= 2 steps when N allows (v7x megacore sharding via the
    "parallel" grid axis)."""
    n128 = _round_up(n, 128)
    if n128 <= 512:
        return n128                           # single cheap step, minimal padding
    half = _round_up((n128 + 1) // 2, 512)    # aim for ~2 grid steps
    return min(MAX_TILE_N, half)


def _mlp_kernel(x_ref, w_ref, b_ref, o_ref):
    """One batch tile of the PINN MLP in transposed (feature, batch) layout.

    x_ref : (2, TILE_N)   input points (normalization folded into layer 1)
    w_ref : (5, 20, 20)   packed weights; [0,:,:2]=W1, [1..3]=W2..W4,
                          [4,:2,:]=W5, zero elsewhere
    b_ref : (5, 20, 1)    packed biases (feature on sublanes, broadcast on lanes)
    o_ref : (2, TILE_N)   (psi, p) per point
    """
    x = x_ref[...]                                          # (2, TILE_N) f32

    # Layer 1 (in=2): VPU broadcast MACs — avoids a K=2 MXU push/pop round trip.
    w0 = w_ref[0]                                           # (20, 20); only [:, :2] used
    z = w0[:, 0:1] * x[0:1, :] + w0[:, 1:2] * x[1:2, :] + b_ref[0]
    a = jnp.tanh(z)                                         # (20, TILE_N)

    # Layers 2..4 (20x20): MXU matmul + lane-broadcast bias + tanh (EUP).
    for i in range(1, NLAYERS - 1):
        a = jnp.tanh(
            jnp.dot(w_ref[i], a, preferred_element_type=jnp.float32) + b_ref[i])

    # Output layer: rows 2..19 of the padded slab are zero; keep rows 0..1.
    z_out = jnp.dot(w_ref[NLAYERS - 1], a,
                    preferred_element_type=jnp.float32) + b_ref[NLAYERS - 1]
    o_ref[...] = z_out[0:LAYERS[-1], :].astype(o_ref.dtype)


def init_params(key, layers=LAYERS):
    """Xavier-normal weights (gain=1.0), zero biases — matches the module init.
    Weights stored PyTorch-style as (out_features, in_features); biases (out, 1)."""
    params = []
    for i in range(len(layers) - 1):
        fan_in, fan_out = layers[i], layers[i + 1]
        key, sub = jax.random.split(key)
        std = math.sqrt(2.0 / (fan_in + fan_out))          # xavier_normal_, gain=1.0
        w = std * jax.random.normal(sub, (fan_out, fan_in), dtype=jnp.float32)
        b = jnp.zeros((fan_out, 1), dtype=jnp.float32)
        params.append((w, b))
    return params


def _pack_params(params, xmin, xmax):
    """Fold input normalization into layer 1 and pack all weights/biases into
    two zero-padded slabs: w_all (5, 20, 20) and b_all (5, 20, 1).

    Correct for scalar OR per-feature (shape (2,)) Xmin/Xmax:
      W1 @ ((X - xmin)/s) + b1 == (W1/s) @ X + (b1 - sum_k W1[:,k]*xmin_k/s_k).
    """
    w1, b1 = params[0]
    xmin_f = jnp.asarray(xmin, jnp.float32)
    s = jnp.asarray(xmax, jnp.float32) - xmin_f
    # Guard: the PyTorch reference would divide by zero if xmax == xmin; we keep
    # the fold finite instead (documented deliberate divergence).
    s = jnp.where(s == 0.0, jnp.float32(1.0), s)
    w1f = w1 / s                                                        # (20, 2)
    b1f = b1 - jnp.sum(w1 * (xmin_f / s), axis=1, keepdims=True)        # (20, 1)

    w_all = jnp.zeros((NLAYERS, HID, HID), jnp.float32)
    b_all = jnp.zeros((NLAYERS, HID, 1), jnp.float32)
    w_all = w_all.at[0, :, :LAYERS[0]].set(w1f)
    b_all = b_all.at[0].set(b1f)
    for i in range(1, NLAYERS - 1):
        w_all = w_all.at[i].set(params[i][0])
        b_all = b_all.at[i].set(params[i][1])
    w_last, b_last = params[NLAYERS - 1]
    w_all = w_all.at[NLAYERS - 1, :LAYERS[-1], :].set(w_last)
    b_all = b_all.at[NLAYERS - 1, :LAYERS[-1]].set(b_last)
    return w_all, b_all


@jax.jit
def sequentialmodel_forward_t(x, y, params, xmin, xmax):
    """Transposed-output forward: returns (2, N) = [psi; p] per point.

    Keeping the (2, N) layout end-to-end avoids an extra whole-batch transpose
    for downstream PINN code; `sequentialmodel_forward` wraps this to match the
    module's (N, 2) convention.
    """
    X_T = jnp.stack([jnp.ravel(x), jnp.ravel(y)], axis=0).astype(jnp.float32)
    N = X_T.shape[1]

    tile_n = _choose_tile_n(N)
    n_pad = _round_up(N, tile_n)
    if n_pad != N:                               # pad only when needed (static)
        X_T = jnp.pad(X_T, ((0, 0), (0, n_pad - N)))

    w_all, b_all = _pack_params(params, xmin, xmax)

    # Cost hint so XLA schedules the surrounding ops sensibly.
    mac = sum(LAYERS[i] * LAYERS[i + 1] for i in range(NLAYERS))        # 1280
    cost = pl.CostEstimate(
        flops=2 * n_pad * mac,
        transcendentals=n_pad * sum(LAYERS[1:-1]),                      # 80 tanh/pt
        bytes_accessed=4 * (n_pad * (LAYERS[0] + LAYERS[-1])
                            + w_all.size + b_all.size),
    )

    out_t = pl.pallas_call(
        _mlp_kernel,
        out_shape=jax.ShapeDtypeStruct((LAYERS[-1], n_pad), jnp.float32),
        grid_spec=pltpu.PrefetchScalarGridSpec(
            num_scalar_prefetch=0,
            grid=(n_pad // tile_n,),
            in_specs=[
                pl.BlockSpec((LAYERS[0], tile_n), lambda i: (0, i)),
                pl.BlockSpec((NLAYERS, HID, HID), lambda i: (0, 0, 0)),  # resident
                pl.BlockSpec((NLAYERS, HID, 1), lambda i: (0, 0, 0)),    # resident
            ],
            out_specs=pl.BlockSpec((LAYERS[-1], tile_n), lambda i: (0, i)),
        ),
        compiler_params=pltpu.CompilerParams(
            dimension_semantics=("parallel",)),
        cost_estimate=cost,
    )(X_T, w_all, b_all)

    return out_t[:, :N]


@jax.jit
def sequentialmodel_forward(x, y, params, xmin, xmax):
    """Equivalent of Sequentialmodel.forward(x, y) -> (N, 2)."""
    return sequentialmodel_forward_t(x, y, params, xmin, xmax).T


def reference_forward(x, y, params, xmin, xmax):
    """Pure-JAX reference (batch-major, like the PyTorch module)."""
    X = jnp.stack([jnp.ravel(x), jnp.ravel(y)], axis=1).astype(jnp.float32)
    a = (X - jnp.asarray(xmin, jnp.float32)) / (
        jnp.asarray(xmax, jnp.float32) - jnp.asarray(xmin, jnp.float32))
    for i, (w, b) in enumerate(params):
        z = a @ w.T + b.T
        a = jnp.tanh(z) if i < len(params) - 1 else z
    return a


if __name__ == "__main__":
    key = jax.random.PRNGKey(0)
    k_params, k_x, k_y = jax.random.split(key, 3)
    params = init_params(k_params)

    # Case 1: N=1000 (not a multiple of the tile -> tests padding and a 2-step
    # grid), scalar Xmin/Xmax like the original script (X_train.min()/max()).
    N = 1000
    x = jax.random.uniform(k_x, (N,), dtype=jnp.float32)
    y = jax.random.uniform(k_y, (N,), dtype=jnp.float32)
    X_all = jnp.stack([x, y], axis=1)
    xmin = float(X_all.min())
    xmax = float(X_all.max())

    out = jax.block_until_ready(sequentialmodel_forward(x, y, params, xmin, xmax))
    ref = reference_forward(x, y, params, xmin, xmax)
    assert out.shape == (N, 2)
    assert jnp.allclose(out, ref, atol=1e-5, rtol=1e-5), "case 1 mismatch vs reference"

    # Case 2: small N (single grid step) with per-feature Xmin/Xmax to exercise
    # the generalized normalization fold.
    N2 = 200
    x2 = 3.0 * jax.random.uniform(jax.random.PRNGKey(1), (N2,), dtype=jnp.float32)
    y2 = 0.5 * jax.random.uniform(jax.random.PRNGKey(2), (N2,), dtype=jnp.float32) - 1.0
    X2 = jnp.stack([x2, y2], axis=1)
    xmin2 = X2.min(axis=0)            # shape (2,)
    xmax2 = X2.max(axis=0)            # shape (2,)
    out2 = jax.block_until_ready(sequentialmodel_forward(x2, y2, params, xmin2, xmax2))
    ref2 = reference_forward(x2, y2, params, xmin2, xmax2)
    assert out2.shape == (N2, 2)
    assert jnp.allclose(out2, ref2, atol=1e-5, rtol=1e-5), "case 2 mismatch vs reference"

    # TODO(synk): weight()/loss_PDE()/loss_PDE2() rely on torch.autograd
    # higher-order gradients and file I/O (training utilities), not the forward
    # pass; intentionally not ported.
    print("KERNEL_OK")
</pallas_src>

<mosaic_0001>
module attributes {stable_mosaic.version = 11 : i64} {
  func.func @_mlp_kernel(%arg0: i32, %arg1: memref<2x512xf32, #tpu.memory_space<vmem>>, %arg2: memref<5x20x20xf32, #tpu.memory_space<vmem>>, %arg3: memref<5x20x1xf32, #tpu.memory_space<vmem>>, %arg4: memref<2x512xf32, #tpu.memory_space<vmem>>) attributes {dimension_semantics = [#tpu.dimension_semantics<parallel>], iteration_bounds = array<i64: 2>, scalar_prefetch = 0 : i64, scratch_operands = 0 : i64, tpu.core_type = #tpu.core_type<tc>, window_params = [{transform_indices = @transform_0, window_bounds = array<i64: 2, 512>}, {pipeline_mode = #tpu.pipeline_mode<synchronous>, transform_indices = @transform_1, window_bounds = array<i64: 5, 20, 20>}, {pipeline_mode = #tpu.pipeline_mode<synchronous>, transform_indices = @transform_2, window_bounds = array<i64: 5, 20, 1>}, {transform_indices = @transform_3, window_bounds = array<i64: 2, 512>}]} {
    %c0 = arith.constant 0 : index
    %c0_0 = arith.constant 0 : index
    %0 = vector.load %arg1[%c0, %c0_0] : memref<2x512xf32, #tpu.memory_space<vmem>>, vector<2x512xf32>
    %c0_1 = arith.constant 0 : index
    %c0_2 = arith.constant 0 : index
    %c0_3 = arith.constant 0 : index
    %1 = vector.load %arg2[%c0_1, %c0_2, %c0_3] : memref<5x20x20xf32, #tpu.memory_space<vmem>>, vector<1x20x20xf32>
    %2 = vector.shape_cast %1 : vector<1x20x20xf32> to vector<20x20xf32>
    %3 = vector.extract_strided_slice %2 {offsets = [0, 0], sizes = [20, 1], strides = [1, 1]} : vector<20x20xf32> to vector<20x1xf32>
    %4 = vector.extract_strided_slice %0 {offsets = [0, 0], sizes = [1, 512], strides = [1, 1]} : vector<2x512xf32> to vector<1x512xf32>
    %5 = vector.broadcast %3 : vector<20x1xf32> to vector<20x512xf32>
    %6 = vector.broadcast %4 : vector<1x512xf32> to vector<20x512xf32>
    %7 = arith.mulf %5, %6 : vector<20x512xf32>
    %8 = vector.extract_strided_slice %2 {offsets = [0, 1], sizes = [20, 1], strides = [1, 1]} : vector<20x20xf32> to vector<20x1xf32>
    %9 = vector.extract_strided_slice %0 {offsets = [1, 0], sizes = [1, 512], strides = [1, 1]} : vector<2x512xf32> to vector<1x512xf32>
    %10 = vector.broadcast %8 : vector<20x1xf32> to vector<20x512xf32>
    %11 = vector.broadcast %9 : vector<1x512xf32> to vector<20x512xf32>
    %12 = arith.mulf %10, %11 : vector<20x512xf32>
    %13 = arith.addf %7, %12 : vector<20x512xf32>
    %c0_4 = arith.constant 0 : index
    %c0_5 = arith.constant 0 : index
    %c0_6 = arith.constant 0 : index
    %14 = vector.load %arg3[%c0_4, %c0_5, %c0_6] : memref<5x20x1xf32, #tpu.memory_space<vmem>>, vector<1x20x1xf32>
    %15 = vector.shape_cast %14 : vector<1x20x1xf32> to vector<20x1xf32>
    %16 = vector.broadcast %15 : vector<20x1xf32> to vector<20x512xf32>
    %17 = arith.addf %13, %16 : vector<20x512xf32>
    %18 = math.tanh %17 : vector<20x512xf32>
    %c1 = arith.constant 1 : index
    %c0_7 = arith.constant 0 : index
    %c0_8 = arith.constant 0 : index
    %19 = vector.load %arg2[%c1, %c0_7, %c0_8] : memref<5x20x20xf32, #tpu.memory_space<vmem>>, vector<1x20x20xf32>
    %20 = vector.shape_cast %19 : vector<1x20x20xf32> to vector<20x20xf32>
    %cst = arith.constant dense<0.000000e+00> : vector<20x512xf32>
    %21 = tpu.matmul %20, %18, %cst {dimension_numbers = #tpu.dot_dimension_numbers<[1], [0], [0], [1], [0, 0, 1, 1], [], []>} : vector<20x20xf32>, vector<20x512xf32>, vector<20x512xf32> -> vector<20x512xf32>
    %c1_9 = arith.constant 1 : index
    %c0_10 = arith.constant 0 : index
    %c0_11 = arith.constant 0 : index
    %22 = vector.load %arg3[%c1_9, %c0_10, %c0_11] : memref<5x20x1xf32, #tpu.memory_space<vmem>>, vector<1x20x1xf32>
    %23 = vector.shape_cast %22 : vector<1x20x1xf32> to vector<20x1xf32>
    %24 = vector.broadcast %23 : vector<20x1xf32> to vector<20x512xf32>
    %25 = arith.addf %21, %24 : vector<20x512xf32>
    %26 = math.tanh %25 : vector<20x512xf32>
    %c2 = arith.constant 2 : index
    %c0_12 = arith.constant 0 : index
    %c0_13 = arith.constant 0 : index
    %27 = vector.load %arg2[%c2, %c0_12, %c0_13] : memref<5x20x20xf32, #tpu.memory_space<vmem>>, vector<1x20x20xf32>
    %28 = vector.shape_cast %27 : vector<1x20x20xf32> to vector<20x20xf32>
    %cst_14 = arith.constant dense<0.000000e+00> : vector<20x512xf32>
    %29 = tpu.matmul %28, %26, %cst_14 {dimension_numbers = #tpu.dot_dimension_numbers<[1], [0], [0], [1], [0, 0, 1, 1], [], []>} : vector<20x20xf32>, vector<20x512xf32>, vector<20x512xf32> -> vector<20x512xf32>
    %c2_15 = arith.constant 2 : index
    %c0_16 = arith.constant 0 : index
    %c0_17 = arith.constant 0 : index
    %30 = vector.load %arg3[%c2_15, %c0_16, %c0_17] : memref<5x20x1xf32, #tpu.memory_space<vmem>>, vector<1x20x1xf32>
    %31 = vector.shape_cast %30 : vector<1x20x1xf32> to vector<20x1xf32>
    %32 = vector.broadcast %31 : vector<20x1xf32> to vector<20x512xf32>
    %33 = arith.addf %29, %32 : vector<20x512xf32>
    %34 = math.tanh %33 : vector<20x512xf32>
    %c3 = arith.constant 3 : index
    %c0_18 = arith.constant 0 : index
    %c0_19 = arith.constant 0 : index
    %35 = vector.load %arg2[%c3, %c0_18, %c0_19] : memref<5x20x20xf32, #tpu.memory_space<vmem>>, vector<1x20x20xf32>
    %36 = vector.shape_cast %35 : vector<1x20x20xf32> to vector<20x20xf32>
    %cst_20 = arith.constant dense<0.000000e+00> : vector<20x512xf32>
    %37 = tpu.matmul %36, %34, %cst_20 {dimension_numbers = #tpu.dot_dimension_numbers<[1], [0], [0], [1], [0, 0, 1, 1], [], []>} : vector<20x20xf32>, vector<20x512xf32>, vector<20x512xf32> -> vector<20x512xf32>
    %c3_21 = arith.constant 3 : index
    %c0_22 = arith.constant 0 : index
    %c0_23 = arith.constant 0 : index
    %38 = vector.load %arg3[%c3_21, %c0_22, %c0_23] : memref<5x20x1xf32, #tpu.memory_space<vmem>>, vector<1x20x1xf32>
    %39 = vector.shape_cast %38 : vector<1x20x1xf32> to vector<20x1xf32>
    %40 = vector.broadcast %39 : vector<20x1xf32> to vector<20x512xf32>
    %41 = arith.addf %37, %40 : vector<20x512xf32>
    %42 = math.tanh %41 : vector<20x512xf32>
    %c4 = arith.constant 4 : index
    %c0_24 = arith.constant 0 : index
    %c0_25 = arith.constant 0 : index
    %43 = vector.load %arg2[%c4, %c0_24, %c0_25] : memref<5x20x20xf32, #tpu.memory_space<vmem>>, vector<1x20x20xf32>
    %44 = vector.shape_cast %43 : vector<1x20x20xf32> to vector<20x20xf32>
    %cst_26 = arith.constant dense<0.000000e+00> : vector<20x512xf32>
    %45 = tpu.matmul %44, %42, %cst_26 {dimension_numbers = #tpu.dot_dimension_numbers<[1], [0], [0], [1], [0, 0, 1, 1], [], []>} : vector<20x20xf32>, vector<20x512xf32>, vector<20x512xf32> -> vector<20x512xf32>
    %c4_27 = arith.constant 4 : index
    %c0_28 = arith.constant 0 : index
    %c0_29 = arith.constant 0 : index
    %46 = vector.load %arg3[%c4_27, %c0_28, %c0_29] : memref<5x20x1xf32, #tpu.memory_space<vmem>>, vector<1x20x1xf32>
    %47 = vector.shape_cast %46 : vector<1x20x1xf32> to vector<20x1xf32>
    %48 = vector.broadcast %47 : vector<20x1xf32> to vector<20x512xf32>
    %49 = arith.addf %45, %48 : vector<20x512xf32>
    %50 = vector.extract_strided_slice %49 {offsets = [0, 0], sizes = [2, 512], strides = [1, 1]} : vector<20x512xf32> to vector<2x512xf32>
    %c0_30 = arith.constant 0 : index
    %c0_31 = arith.constant 0 : index
    %51 = vector.load %arg4[%c0_30, %c0_31] : memref<2x512xf32, #tpu.memory_space<vmem>>, vector<2x512xf32>
    tpu.vector_store %arg4[%c0_30, %c0_31], %50 {strides = array<i32>} : memref<2x512xf32, #tpu.memory_space<vmem>>, vector<2x512xf32>,
    return
  }
  func.func @transform_0(%arg0: i32) -> (i32, i32) {
    %c0_i32 = arith.constant 0 : i32
    %c0_i32_0 = arith.constant 0 : i32
    return %c0_i32, %arg0 : i32, i32
  }
  func.func @transform_1(%arg0: i32) -> (i32, i32, i32) {
    %c0_i32 = arith.constant 0 : i32
    %c0_i32_0 = arith.constant 0 : i32
    %c0_i32_1 = arith.constant 0 : i32
    %c0_i32_2 = arith.constant 0 : i32
    return %c0_i32, %c0_i32_0, %c0_i32_1 : i32, i32, i32
  }
  func.func @transform_2(%arg0: i32) -> (i32, i32, i32) {
    %c0_i32 = arith.constant 0 : i32
    %c0_i32_0 = arith.constant 0 : i32
    %c0_i32_1 = arith.constant 0 : i32
    %c0_i32_2 = arith.constant 0 : i32
    return %c0_i32, %c0_i32_0, %c0_i32_1 : i32, i32, i32
  }
  func.func @transform_3(%arg0: i32) -> (i32, i32) {
    %c0_i32 = arith.constant 0 : i32
    %c0_i32_0 = arith.constant 0 : i32
    return %c0_i32, %arg0 : i32, i32
  }
}

</mosaic_0001>

<bundles_post_ra>
// kernel: sequentialmodel_forward_t.1
= control target key start
LH: loop header
LB: loop body
LE: loop exit
PB: predicated region body
PF: predicated region fallthrough
CT: control target
= control target key end

     0   :  { %8 = vsyncpa [#allocation3], 0  ;;  %s1923_s0 = inlined_call_operand.vmem [shape: f32[2,1024], index: 0, kind: input, shape index: {}]   ;;  %s1924_s1 = inlined_call_operand.vmem [shape: f32[5,20,20], index: 1, kind: input, shape index: {}]   ;;  %s1925_s2 = inlined_call_operand.vmem [shape: f32[5,20,1], index: 2, kind: input, shape index: {}]   ;;  %s1926_s3 = inlined_call_operand.hbm [shape: f32[2,1024], index: 3, kind: output, shape index: {}]  }
   0x1   :  { %10 = vsyncpa [#allocation3 + $0x1], 0  ;;  %s1661_s12 = smov 0   ;;  %s1663_s13 = smov 0  }
   0x2   :  { %s1665_s14 = smov 0   ;;  %s1667_s15 = smov 0  }
   0x3 LB: > { %s1682_s16 = sadd.s32 4294967295, %s1634_s15   ;;  %s1319_s17 = sadd.s32 4294967294, %s1634_s15   ;;  %s1634_s15 = sphi %s1667_s15, %s1932_s15   ;;  %s1630_s14 = sphi %s1665_s14, %s1931_s14   ;;  %s1626_s13 = sphi %s1663_s13, %s1930_s13   ;;  %s1622_s12 = sphi %s1661_s12, %s1929_s12  }
   0x4   : > { %s1686_s18 = sadd.s32 1, %s1634_s15   ;;  %s91_s19 = sadd.s32 1, %s1630_s14 }
   0x5   : > { %s88_s20 = ssub.s32 %s1634_s15, %s1686_s18  ;;  %p101_p0 = scmp.ne.s32.totalorder %s1630_s14, %s1626_s13 }
   0x6   : > { %p89_p1 = scmp.eq.s32.totalorder %s88_s20, 0  ;;  %p102_p2 = scmp.eq.s32.totalorder %s1682_s16, 1 }
   0x7   : > { %p107_p3 = scmp.ne.s32.totalorder %s1626_s13, %s1622_s12  ;;  %p108_p4 = scmp.eq.s32.totalorder %s1319_s17, 1 }
   0x8   : > { %s1697_s21 = scalar_select %p89_p1, %s1630_s14, %s91_s19  }
   0x9   : > { %p1699_p5 = por %p102_p2, %p101_p0  ;;  %p1703_p6 = por %p108_p4, %p107_p3 }
   0xa   : > { %p1322_p7 = scmp.ge.s32.totalorder %s1634_s15, 1  ;;  %p141_p8 = scmp.lt.s32.totalorder %s1634_s15, 3 }
   0xc   : > { %p142_p9 = pnand %p1322_p7, %p141_p8 }
   0xd   : > { %v173_v0 = vld [vmem:[%s1924_s1] sm:$0xff] (!%p142_p9)  ;;  %v1636_v1 = vmov (!%p142_p9), 1   ;;  %v1637_v2 = vmov (!%p142_p9), 0   ;;  %v174_v3 = vld [vmem:[%s1924_s1 + $0x8] sm:$0xff] (!%p142_p9)  ;;  %v175_v6 = vld [vmem:[%s1924_s1 + $0x10] sm:$0xf] (!%p142_p9)  ;;  %v192_v19 = vlaneseq (!%p142_p9) }
   0xe   : > { %145 = sbr.rel (%p142_p9) target bundleno = 1128 (0x468), region = 32  ;;  %1472 = vset.pattern.permute.xlu1 (!%p142_p9), %v1636_v1  ;;  %1471 = vset.pattern.permute.xlu0 (!%p142_p9), %v1637_v2  ;;  %v312_v4 = vld [vmem:[%s1925_s2] sm:$0xff] (!%p142_p9)  ;;  %v313_v5 = vld [vmem:[%s1925_s2 + $0x8] sm:$0xff] (!%p142_p9)  ;;  %v314_v7 = vld [vmem:[%s1925_s2 + $0x10] sm:$0xf] (!%p142_p9)  ;;  %v1638_v13 = vmov (!%p142_p9), 0.0  }
   0xf   : > { %241 = vperm.xlu1 (!%p142_p9), %1472, %v173_v0   ;;  %178 = vperm.xlu0 (!%p142_p9), %1471, %v173_v0   ;;  %v1330_v8 = vld [vmem:[%s1925_s2 + $0x20] sm:$0xff] (!%p142_p9)  ;;  %v1345_v9 = vld [vmem:[%s1925_s2 + $0x30] sm:$0xff] (!%p142_p9)  ;;  %v1329_v14 = vld [vmem:[%s1925_s2 + $0x18] sm:$0xff] (!%p142_p9)  ;;  %s1324_s11 = sshll.u32 (!%p142_p9), %s1682_s16, 2  ;;  %v1760_v20 = vshrl.u32 (!%p142_p9), %v192_v19, 7  ;;  %vm387_vm0 = vcmask (!%p142_p9), 1043456  }
  0x10   : > { %v1347_v10 = vld [vmem:[%s1925_s2 + $0x40] sm:$0xf] (!%p142_p9)  ;;  %v1362_v11 = vld [vmem:[%s1925_s2 + $0x50] sm:$0xff] (!%p142_p9)  ;;  %464 = vmatprep.mubr.f32.mxu0 (!%p142_p9), %v1638_v13  ;;  %547 = vmatprep.mubr.f32.mxu1 (!%p142_p9), %v1638_v13  ;;  %v1331_v15 = vld [vmem:[%s1925_s2 + $0x28] sm:$0xf] (!%p142_p9)  ;;  %p166_p10 = scmp.lt.s32.totalorder (!%p142_p9), %s1324_s11, 7 }
  0x11   : > { %v1377_v12 = vld [vmem:[%s1925_s2 + $0x60] sm:$0xff] (!%p142_p9)  ;;  %v1346_v16 = vld [vmem:[%s1925_s2 + $0x38] sm:$0xff] (!%p142_p9)  ;;  %v1361_v17 = vld [vmem:[%s1925_s2 + $0x48] sm:$0xff] (!%p142_p9)  ;;  %v254_v21 = vsub.s32 (!%p142_p9), 1, %v1760_v20  ;;  %v258_v22 = vsub.s32 (!%p142_p9), 3, %v1760_v20  ;;  %v262_v23 = vsub.s32 (!%p142_p9), 5, %v1760_v20 }
  0x12   : > { %v1363_v18 = vld [vmem:[%s1925_s2 + $0x58] sm:$0xf] (!%p142_p9)  ;;  %v194_v25 = vsub.s32 (!%p142_p9), 0, %v1760_v20  ;;  %v198_v26 = vsub.s32 (!%p142_p9), 2, %v1760_v20  ;;  %v202_v27 = vsub.s32 (!%p142_p9), 4, %v1760_v20  ;;  %v266_v28 = vsub.s32 (!%p142_p9), 7, %v1760_v20 }
  0x13   : > { %245 = vperm.xlu1 (!%p142_p9), %1472, %v174_v3   ;;  %183 = vperm.xlu0 (!%p142_p9), %1471, %v174_v3   ;;  %v206_v29 = vsub.s32 (!%p142_p9), 6, %v1760_v20  ;;  %vm377_vm1 = vcmask (!%p142_p9), 162816   ;;  %s162_s4 = sand.u32 (!%p142_p9), 1, %s1626_s13   ;;  %s1395_s6 = sshll.u32 (!%p142_p9), %s1682_s16, 7 }
  0x14   : > { %s1323_s5 = sshll.u32 (!%p142_p9), %s162_s4, 3  ;;  %s1246_s16 = scalar_lea.sflag (!%p142_p9), [#allocation3], %s162_s4 }
  0x15   : > { %s1934_s11 = smov (!%p166_p10, %s1324_s11), 7  ;;  %s164_s7 = scalar_lea.vmem [#allocation2], %s1323_s5 }
  0x16   : > { %s1325_s17 = sshll.u32 %s1934_s11, 1  ;;  %s1260_s8 = sshll.u32 %s164_s7, 4  ;;  %s1881_s8 = int_to_ptr.vmem [resolvable:$true] %s1260_s8 }
  0x17   : > { %1473 = vset.pattern.permute.xlu1 %v1637_v2  ;;  %317 = vperm.xlu0 %1471, %v312_v4   ;;  %s169_s24 = scalar_lea.vmem %s1923_s0, %s1325_s17  ;;  %s1879_s11 = scalar_lea.hbm %s1926_s3, %s1395_s6 }
  0x18   : > { %322 = vperm.xlu1 %1473, %v313_v5   ;;  %v172_v24 = vld [vmem:[%s169_s24] sm:$0xff]  ;;  %s1572_s17 = scalar_lea.vmem %s1881_s8, 128  ;;  %s1640_s19 = smov [#allocation2]  }
  0x19   : > { %v255_v30 = vrot.slane %v172_v24, %v254_v21  ;;  %v259_v31 = vrot.slane %v172_v24, %v258_v22  ;;  %v263_v32 = vrot.slane %v172_v24, %v262_v23  ;;  %v195_v33 = vrot.slane %v172_v24, %v194_v25  ;;  %p1573_p11 = scmp.ne.s32.totalorder %s1881_s8, %s1572_s17  ;;  %s1576_s20 = sshll.u32 %s1640_s19, 4  ;;  %s1577_s20 = int_to_ptr.vmem [resolvable:$false] %s1576_s20 }
  0x1a   : > { %v199_v34 = vrot.slane %v172_v24, %v198_v26  ;;  %v203_v35 = vrot.slane %v172_v24, %v202_v27  ;;  %v267_v36 = vrot.slane %v172_v24, %v266_v28  ;;  %v207_v37 = vrot.slane %v172_v24, %v206_v29  ;;  %s1578_s24 = scalar_lea.vmem %s1577_s20, 256  ;;  %p1579_p0 = scmp.lt.s32.totalorder %s1881_s8, %s1577_s20 }
  0x1b   : > { %188 = vperm.xlu0 %1471, %v175_v6   ;;  %v275_v38 = vrot.slane %v255_v30, %v254_v21  ;;  %v279_v39 = vrot.slane %v259_v31, %v254_v21  ;;  %v283_v40 = vrot.slane %v263_v32, %v254_v21  ;;  %v215_v41 = vrot.slane %v195_v33, %v194_v25  ;;  %p1574_p12 = pnand %p1573_p11, %p1699_p5  ;;  %p1580_p1 = scmp.lt.s32.totalorder %s1578_s24, %s1572_s17 }
  0x1c   : > { %1474 = vset.pattern.permute.xlu1 %v1636_v1  ;;  %v219_v42 = vrot.slane %v199_v34, %v194_v25  ;;  %v223_v43 = vrot.slane %v203_v35, %v194_v25  ;;  %v287_v45 = vrot.slane %v267_v36, %v254_v21  ;;  %v227_v47 = vrot.slane %v207_v37, %v194_v25 }
  0x1d   : > { %249 = vperm.xlu1 %1474, %v175_v6   ;;  %p1575_p13 = pneg %p1574_p12  ;;  %p1581_p2 = por %p1580_p1, %p1579_p0 }
  0x1f   : > { %327 = vperm.xlu0 %1471, %v314_v7   ;;  %p1582_p3 = pnand %p1581_p2, %p1575_p13 }
  0x21   : > { %1475 = vset.pattern.permute.xlu1 %v1637_v2 }
  0x22   : > { %364 = vperm.xlu1 %1475, %v1329_v14  }
  0x23   : > { %369 = vperm.xlu0 %1471, %v1330_v8  }
  0x26   : > { %374 = vperm.xlu1 %1475, %v1331_v15  }
  0x27   : > { %588 = vperm.xlu0 %1471, %v1345_v9  }
  0x2a   : > { %593 = vperm.xlu1 %1475, %v1346_v16  }
  0x2b   : > { %598 = vperm.xlu0 %1471, %v1347_v10  }
  0x2e   : > { %810 = vperm.xlu1 %1475, %v1361_v17  }
  0x2f   : > { %815 = vperm.xlu0 %1471, %v1362_v11  }
  0x32   : > { %820 = vperm.xlu1 %1475, %v1363_v18  }
  0x33   : > { %1032 = vperm.xlu0 %1471, %v1377_v12  }
  0x8e   : > { %v242_v44 = vpop.permute.xlu1 %241  ;;  %v179_v46 = vpop.permute.xlu0 %178 }
  0x8f   : > { %v288_v48 = vmul.f32 %v275_v38, %v242_v44  ;;  %v289_v49 = vmul.f32 %v279_v39, %v242_v44  ;;  %v290_v50 = vmul.f32 %v283_v40, %v242_v44  ;;  %v228_v51 = vmul.f32 %v215_v41, %v179_v46 }
  0x90   : > { %v229_v52 = vmul.f32 %v219_v42, %v179_v46  ;;  %v230_v53 = vmul.f32 %v223_v43, %v179_v46  ;;  %v291_v54 = vmul.f32 %v287_v45, %v242_v44  ;;  %v231_v55 = vmul.f32 %v227_v47, %v179_v46 }
  0x91   : > { %v300_v2 = vadd.f32 %v288_v48, %v228_v51 }
  0x92   : > { %v246_v56 = vpop.permute.xlu1 %245  ;;  %v184_v57 = vpop.permute.xlu0 %183  ;;  %v301_v3 = vadd.f32 %v289_v49, %v229_v52  ;;  %v302_v4 = vadd.f32 %v290_v50, %v230_v53  ;;  %v303_v6 = vadd.f32 %v291_v54, %v231_v55  ;;  %v1326_v55 = vld [vmem:[%s1924_s1 + $0x18] sm:$0xff] }
  0x93   : > { %v292_v58 = vmul.f32 %v275_v38, %v246_v56  ;;  %v293_v59 = vmul.f32 %v279_v39, %v246_v56  ;;  %v294_v60 = vmul.f32 %v283_v40, %v246_v56  ;;  %v295_v61 = vmul.f32 %v287_v45, %v246_v56 }
  0x94   : > { %v232_v62 = vmul.f32 %v215_v41, %v184_v57  ;;  %v233_v63 = vmul.f32 %v219_v42, %v184_v57  ;;  %v234_v0 = vmul.f32 %v223_v43, %v184_v57  ;;  %v235_v1 = vmul.f32 %v227_v47, %v184_v57 }
  0x96   : > { %v318_v5 = vpop.permute.xlu0 %317  ;;  %v304_v7 = vadd.f32 %v292_v58, %v232_v62  ;;  %v305_v8 = vadd.f32 %v293_v59, %v233_v63  ;;  %v306_v9 = vadd.f32 %v294_v60, %v234_v0  ;;  %v307_v15 = vadd.f32 %v295_v61, %v235_v1  ;;  %v1327_v58 = vld [vmem:[%s1924_s1 + $0x20] sm:$0xff]  ;;  %v1328_v59 = vld [vmem:[%s1924_s1 + $0x28] sm:$0xf] }
  0x97   : > { %v330_v10 = vadd.f32 %v318_v5, %v300_v2  ;;  %v331_v11 = vadd.f32 %v318_v5, %v301_v3  ;;  %v332_v12 = vadd.f32 %v318_v5, %v302_v4  ;;  %v323_v14 = vpop.permute.xlu1 %322  ;;  %v333_v16 = vadd.f32 %v318_v5, %v303_v6 }
  0x98   : > { %v334_v17 = vadd.f32 %v323_v14, %v304_v7  ;;  %v335_v18 = vadd.f32 %v323_v14, %v305_v8  ;;  %v336_v21 = vadd.f32 %v323_v14, %v306_v9  ;;  %v337_v22 = vadd.f32 %v323_v14, %v307_v15 }
  0x99   : > { %1476 = vtanh.f32 %v330_v10 }
  0x9a   : > { %1478 = vtanh.f32 %v331_v11  ;;  %v189_v19 = vpop.permute.xlu0 %188 }
  0x9b   : > { %1480 = vtanh.f32 %v332_v12  ;;  %v236_v23 = vmul.f32 %v215_v41, %v189_v19  ;;  %v237_v24 = vmul.f32 %v219_v42, %v189_v19  ;;  %v238_v25 = vmul.f32 %v223_v43, %v189_v19 }
  0x9c   : > { %1482 = vtanh.f32 %v333_v16  ;;  %v250_v26 = vpop.permute.xlu1 %249  ;;  %v239_v30 = vmul.f32 %v227_v47, %v189_v19 }
  0x9d   : > { %1484 = vtanh.f32 %v334_v17  ;;  %v296_v27 = vmul.f32 %v275_v38, %v250_v26  ;;  %v297_v28 = vmul.f32 %v279_v39, %v250_v26  ;;  %v298_v29 = vmul.f32 %v283_v40, %v250_v26 }
  0x9e   : > { %1486 = vtanh.f32 %v335_v18  ;;  %v299_v31 = vmul.f32 %v287_v45, %v250_v26  ;;  %v328_v35 = vpop.permute.xlu0 %327 }
  0x9f   : > { %1488 = vtanh.f32 %v336_v21  ;;  %v308_v32 = vadd.f32 %v296_v27, %v236_v23  ;;  %v309_v33 = vadd.f32 %v297_v28, %v237_v24  ;;  %v310_v34 = vadd.f32 %v298_v29, %v238_v25 }
  0xa0   : > { %1490 = vtanh.f32 %v337_v22  ;;  %v311_v36 = vadd.f32 %v299_v31, %v239_v30 }
  0xa1   : > { %v338_v37 = vadd.f32 %v328_v35, %v308_v32  ;;  %v339_v44 = vadd.f32 %v328_v35, %v309_v33  ;;  %v340_v41 = vadd.f32 %v328_v35, %v310_v34  ;;  %v365_v60 = vpop.permute.xlu1 %364 }
  0xa2   : > { %v341_v42 = vadd.f32 %v328_v35, %v311_v36  ;;  %v370_v4 = vpop.permute.xlu0 %369 }
  0xa3   : > { %v1477_v43 = vpop.eup %1476  ;;  %1492 = vtanh.f32 %v338_v37 }
  0xa4   : > { %v1479_v46 = vpop.eup %1478  ;;  %1494 = vtanh.f32 %v339_v44 }
  0xa5   : > { %v1481_v38 = vpop.eup %1480  ;;  %1496 = vtanh.f32 %v340_v41  ;;  %v375_v16 = vpop.permute.xlu1 %374  ;;  %v1342_v41 = vld [vmem:[%s1924_s1 + $0x30] sm:$0xff] }
  0xa6   : > { %v1483_v39 = vpop.eup %1482  ;;  %1498 = vtanh.f32 %v341_v42 }
  0xa7   : > { %v1485_v40 = vpop.eup %1484 }
  0xa8   : > { %v1487_v45 = vpop.eup %1486  ;;  %v1398_v47 = vpack.c.bf16 %v1485_v40, %v1477_v43 }
  0xa9   : > { %v1489_v48 = vpop.eup %1488  ;;  %v1396_v49 = vpack.c.bf16 %v1487_v45, %v1479_v46  ;;  %v1343_v46 = vld [vmem:[%s1924_s1 + $0x38] sm:$0xff] }
  0xaa   : > { %v1491_v50 = vpop.eup %1490  ;;  %v1402_v51 = vpack.c.bf16 %v1489_v48, %v1481_v38  ;;  %v1344_v38 = vld [vmem:[%s1924_s1 + $0x40] sm:$0xf] }
  0xab   : > { %1397 = vmatprep.subr.bf16.mxu0 %v1396_v49  ;;  %v1400_v52 = vpack.c.bf16 %v1491_v50, %v1483_v39  ;;  %v589_v39 = vpop.permute.xlu0 %588 }
  0xac   : > { %1399 = vmatpush1.bf16.msra.mxu0 %v1398_v47 }
  0xad   : > { %v1493_v53 = vpop.eup %1492  ;;  %1401 = vmatprep.subr.bf16.mxu1 %v1400_v52  ;;  %v594_v52 = vpop.permute.xlu1 %593 }
  0xae   : > { %v1495_v54 = vpop.eup %1494  ;;  %1403 = vmatpush1.bf16.msra.mxu1 %v1402_v51 }
  0xaf   : > { %v1497_v56 = vpop.eup %1496  ;;  %1332 = vmatprep.subr.msk.mxu0 %vm387_vm0, %v1495_v54 }
  0xb0   : > { %v1499_v57 = vpop.eup %1498  ;;  %1333 = vmatpush1.msk.msra.mxu0 %vm387_vm0, %v1493_v53 }
  0xb1   : > { %1337 = vmatprep.subr.msk.mxu1 %vm387_vm0, %v1499_v57  ;;  %1334 = vmatmul.mubr.msk.f32.vlgmr.msra.gmra.mrb[0].mxu0 %vm377_vm1, %v1326_v55 }
  0xb2   : > { %1338 = vmatpush1.msk.msra.mxu1 %vm387_vm0, %v1497_v56  ;;  %470 = vmatprep.mubr.f32.mxu0 %v1638_v13 }
  0xb3   : > { %1339 = vmatmul.mubr.msk.f32.vlgmr.msra.gmra.mrb[0].mxu1 %vm377_vm1, %v1326_v55 }
  0xb4   : > { %553 = vmatprep.mubr.f32.mxu1 %v1638_v13 }
  0xb5   : > { %1335 = vmatmul.mubr.msk.f32.gmra.mrb[2].mxu0 %vm377_vm1, %v1327_v58 }
  0xb6   : > { %476 = vmatprep.mubr.f32.mxu0 %v1638_v13 }
  0xb7   : > { %1340 = vmatmul.mubr.msk.f32.gmra.mrb[2].mxu1 %vm377_vm1, %v1327_v58 }
  0xb8   : > { %559 = vmatprep.mubr.f32.mxu1 %v1638_v13 }
  0xb9   : > { %1336 = vmatmul.mubr.msk.f32.gmra.mrb[4].mxu0 %vm377_vm1, %v1328_v59 }
  0xba   : > { %686 = vmatprep.mubr.f32.mxu0 %v1638_v13 }
  0xbb   : > { %1341 = vmatmul.mubr.msk.f32.gmra.mrb[4].mxu1 %vm377_vm1, %v1328_v59 }
  0xbc   : > { %769 = vmatprep.mubr.f32.mxu1 %v1638_v13 }
 0x184   : > { %v466_v61 = vpop.f32.mrb[0].mxu0 }
 0x185   : > { %v467_v62 = vadd.f32 %v466_v61, %v365_v60  ;;  %v468_v63 = vpop.f32.mrb[1].mxu0 }
 0x186   : > { %v549_v0 = vpop.f32.mrb[0].mxu1  ;;  %v469_v1 = vadd.f32 %v468_v63, %v365_v60  ;;  %v599_v63 = vpop.permute.xlu0 %598 }
 0x187   : > { %1500 = vtanh.f32 %v467_v62  ;;  %v550_v2 = vadd.f32 %v549_v0, %v365_v60  ;;  %v551_v3 = vpop.f32.mrb[1].mxu1 }
 0x188   : > { %1502 = vtanh.f32 %v469_v1  ;;  %v552_v5 = vadd.f32 %v551_v3, %v365_v60  ;;  %v472_v6 = vpop.f32.mrb[2].mxu0 }
 0x189   : > { %1504 = vtanh.f32 %v550_v2  ;;  %v473_v7 = vadd.f32 %v472_v6, %v370_v4  ;;  %v474_v8 = vpop.f32.mrb[3].mxu0 }
 0x18a   : > { %1506 = vtanh.f32 %v552_v5  ;;  %v555_v9 = vpop.f32.mrb[2].mxu1  ;;  %v475_v10 = vadd.f32 %v474_v8, %v370_v4 }
 0x18b   : > { %1508 = vtanh.f32 %v473_v7  ;;  %v556_v11 = vadd.f32 %v555_v9, %v370_v4  ;;  %v557_v12 = vpop.f32.mrb[3].mxu1 }
 0x18c   : > { %1510 = vtanh.f32 %v475_v10  ;;  %v558_v14 = vadd.f32 %v557_v12, %v370_v4  ;;  %v478_v15 = vpop.f32.mrb[4].mxu0 }
 0x18d   : > { %1512 = vtanh.f32 %v556_v11  ;;  %v480_v17 = vpop.f32.mrb[5].mxu0  ;;  %v479_v21 = vadd.f32 %v478_v15, %v375_v16 }
 0x18e   : > { %1514 = vtanh.f32 %v558_v14  ;;  %v561_v18 = vpop.f32.mrb[4].mxu1  ;;  %v481_v19 = vadd.f32 %v480_v17, %v375_v16 }
 0x18f   : > { %v563_v22 = vpop.f32.mrb[5].mxu1  ;;  %v562_v25 = vadd.f32 %v561_v18, %v375_v16 }
 0x190   : > { %1516 = vtanh.f32 %v481_v19  ;;  %v564_v23 = vadd.f32 %v563_v22, %v375_v16 }
 0x191   : > { %v1501_v24 = vpop.eup %1500 }
 0x192   : > { %v1503_v26 = vpop.eup %1502  ;;  %1518 = vtanh.f32 %v564_v23  ;;  %v1358_v23 = vld [vmem:[%s1924_s1 + $0x48] sm:$0xff] }
 0x193   : > { %v1505_v27 = vpop.eup %1504  ;;  %1520 = vtanh.f32 %v479_v21 }
 0x194   : > { %v1507_v28 = vpop.eup %1506  ;;  %1522 = vtanh.f32 %v562_v25 }
 0x195   : > { %v1509_v29 = vpop.eup %1508 }
 0x196   : > { %v1511_v30 = vpop.eup %1510  ;;  %v1406_v31 = vpack.c.bf16 %v1509_v29, %v1501_v24 }
 0x197   : > { %v1513_v32 = vpop.eup %1512  ;;  %v1404_v33 = vpack.c.bf16 %v1511_v30, %v1503_v26  ;;  %v1359_v26 = vld [vmem:[%s1924_s1 + $0x50] sm:$0xff] }
 0x198   : > { %v1515_v34 = vpop.eup %1514  ;;  %v1410_v35 = vpack.c.bf16 %v1513_v32, %v1505_v27  ;;  %v1360_v27 = vld [vmem:[%s1924_s1 + $0x58] sm:$0xf] }
 0x199   : > { %1405 = vmatprep.subr.bf16.mxu0 %v1404_v33  ;;  %v1408_v36 = vpack.c.bf16 %v1515_v34, %v1507_v28  ;;  %v811_v28 = vpop.permute.xlu1 %810 }
 0x19a   : > { %v1517_v37 = vpop.eup %1516  ;;  %1407 = vmatpush1.bf16.msra.mxu0 %v1406_v31 }
 0x19b   : > { %1409 = vmatprep.subr.bf16.mxu1 %v1408_v36  ;;  %1348 = vmatprep.subr.msk.mxu0 %vm387_vm0, %v1517_v37  ;;  %v816_v36 = vpop.permute.xlu0 %815 }
 0x19c   : > { %v1519_v44 = vpop.eup %1518  ;;  %1411 = vmatpush1.bf16.msra.mxu1 %v1410_v35 }
 0x19d   : > { %v1521_v42 = vpop.eup %1520  ;;  %1353 = vmatprep.subr.msk.mxu1 %vm387_vm0, %v1519_v44 }
 0x19e   : > { %1349 = vmatpush1.msk.msra.mxu0 %vm387_vm0, %v1521_v42  ;;  %v1523_v43 = vpop.eup %1522 }
 0x19f   : > { %1350 = vmatmul.mubr.msk.f32.vlgmr.msra.gmra.mrb[6].mxu0 %vm377_vm1, %v1342_v41 }
 0x1a0   : > { %1354 = vmatpush1.msk.msra.mxu1 %vm387_vm0, %v1523_v43  ;;  %692 = vmatprep.mubr.f32.mxu0 %v1638_v13 }
 0x1a1   : > { %1355 = vmatmul.mubr.msk.f32.vlgmr.msra.gmra.mrb[6].mxu1 %vm377_vm1, %v1342_v41 }
 0x1a2   : > { %775 = vmatprep.mubr.f32.mxu1 %v1638_v13 }
 0x1a3   : > { %1351 = vmatmul.mubr.msk.f32.gmra.mrb[8].mxu0 %vm377_vm1, %v1343_v46 }
 0x1a4   : > { %698 = vmatprep.mubr.f32.mxu0 %v1638_v13 }
 0x1a5   : > { %1356 = vmatmul.mubr.msk.f32.gmra.mrb[8].mxu1 %vm377_vm1, %v1343_v46 }
 0x1a6   : > { %781 = vmatprep.mubr.f32.mxu1 %v1638_v13 }
 0x1a7   : > { %1352 = vmatmul.mubr.msk.f32.gmra.mrb[10].mxu0 %vm377_vm1, %v1344_v38 }
 0x1a8   : > { %908 = vmatprep.mubr.f32.mxu0 %v1638_v13 }
 0x1a9   : > { %1357 = vmatmul.mubr.msk.f32.gmra.mrb[10].mxu1 %vm377_vm1, %v1344_v38 }
 0x1aa   : > { %991 = vmatprep.mubr.f32.mxu1 %v1638_v13 }
 0x272   : > { %v688_v40 = vpop.f32.mrb[6].mxu0 }
 0x273   : > { %v689_v45 = vadd.f32 %v688_v40, %v589_v39  ;;  %v690_v47 = vpop.f32.mrb[7].mxu0 }
 0x274   : > { %v771_v48 = vpop.f32.mrb[6].mxu1  ;;  %v691_v49 = vadd.f32 %v690_v47, %v589_v39  ;;  %v821_v47 = vpop.permute.xlu1 %820 }
 0x275   : > { %1524 = vtanh.f32 %v689_v45  ;;  %v772_v50 = vadd.f32 %v771_v48, %v589_v39  ;;  %v773_v51 = vpop.f32.mrb[7].mxu1 }
 0x276   : > { %1526 = vtanh.f32 %v691_v49  ;;  %v774_v53 = vadd.f32 %v773_v51, %v589_v39  ;;  %v694_v54 = vpop.f32.mrb[8].mxu0 }
 0x277   : > { %1528 = vtanh.f32 %v772_v50  ;;  %v695_v55 = vadd.f32 %v694_v54, %v594_v52  ;;  %v696_v56 = vpop.f32.mrb[9].mxu0 }
 0x278   : > { %1530 = vtanh.f32 %v774_v53  ;;  %v777_v57 = vpop.f32.mrb[8].mxu1  ;;  %v697_v58 = vadd.f32 %v696_v56, %v594_v52 }
 0x279   : > { %1532 = vtanh.f32 %v695_v55  ;;  %v778_v59 = vadd.f32 %v777_v57, %v594_v52  ;;  %v779_v60 = vpop.f32.mrb[9].mxu1 }
 0x27a   : > { %1534 = vtanh.f32 %v697_v58  ;;  %v780_v61 = vadd.f32 %v779_v60, %v594_v52  ;;  %v700_v62 = vpop.f32.mrb[10].mxu0 }
 0x27b   : > { %1536 = vtanh.f32 %v778_v59  ;;  %v702_v0 = vpop.f32.mrb[11].mxu0  ;;  %v701_v3 = vadd.f32 %v700_v62, %v599_v63 }
 0x27c   : > { %1538 = vtanh.f32 %v780_v61  ;;  %v783_v1 = vpop.f32.mrb[10].mxu1  ;;  %v703_v2 = vadd.f32 %v702_v0, %v599_v63 }
 0x27d   : > { %v785_v4 = vpop.f32.mrb[11].mxu1  ;;  %v784_v7 = vadd.f32 %v783_v1, %v599_v63 }
 0x27e   : > { %1540 = vtanh.f32 %v703_v2  ;;  %v786_v5 = vadd.f32 %v785_v4, %v599_v63 }
 0x27f   : > { %v1525_v6 = vpop.eup %1524 }
 0x280   : > { %v1527_v8 = vpop.eup %1526  ;;  %1542 = vtanh.f32 %v786_v5  ;;  %v1374_v5 = vld [vmem:[%s1924_s1 + $0x60] sm:$0xff] }
 0x281   : > { %v1529_v9 = vpop.eup %1528  ;;  %1544 = vtanh.f32 %v701_v3 }
 0x282   : > { %v1531_v10 = vpop.eup %1530  ;;  %1546 = vtanh.f32 %v784_v7 }
 0x283   : > { %v1533_v11 = vpop.eup %1532 }
 0x284   : > { %v1535_v12 = vpop.eup %1534  ;;  %v1414_v14 = vpack.c.bf16 %v1533_v11, %v1525_v6 }
 0x285   : > { %v1537_v15 = vpop.eup %1536  ;;  %v1412_v16 = vpack.c.bf16 %v1535_v12, %v1527_v8  ;;  %v1375_v8 = vld [vmem:[%s1924_s1 + $0x68] sm:$0xff] }
 0x286   : > { %v1539_v17 = vpop.eup %1538  ;;  %v1418_v18 = vpack.c.bf16 %v1537_v15, %v1529_v9  ;;  %v1376_v9 = vld [vmem:[%s1924_s1 + $0x70] sm:$0xf] }
 0x287   : > { %1413 = vmatprep.subr.bf16.mxu0 %v1412_v16  ;;  %v1416_v19 = vpack.c.bf16 %v1539_v17, %v1531_v10  ;;  %v1639_v10 = vmov 1983009808  }
 0x288   : > { %v1541_v21 = vpop.eup %1540  ;;  %1415 = vmatpush1.bf16.msra.mxu0 %v1414_v14  ;;  %v1229_v11 = vunpack.c.l.s4 %v1639_v10  ;;  %v1033_v14 = vpop.permute.xlu0 %1032 }
 0x289   : > { %1417 = vmatprep.subr.bf16.mxu1 %v1416_v19  ;;  %1364 = vmatprep.subr.msk.mxu0 %vm387_vm0, %v1541_v21 }
 0x28a   : > { %v1543_v22 = vpop.eup %1542  ;;  %1419 = vmatpush1.bf16.msra.mxu1 %v1418_v18  ;;  %v1230_v12 = vunpack.c.0.s8 %v1229_v11 }
 0x28b   : > { %v1545_v24 = vpop.eup %1544  ;;  %1369 = vmatprep.subr.msk.mxu1 %vm387_vm0, %v1543_v22 }
 0x28c   : > { %1365 = vmatpush1.msk.msra.mxu0 %vm387_vm0, %v1545_v24  ;;  %v1547_v25 = vpop.eup %1546  ;;  %v1233_v21 = vsub.s32 %v1230_v12, %v1760_v20 }
 0x28d   : > { %1366 = vmatmul.mubr.msk.f32.vlgmr.msra.gmra.mrb[12].mxu0 %vm377_vm1, %v1358_v23 }
 0x28e   : > { %1370 = vmatpush1.msk.msra.mxu1 %vm387_vm0, %v1547_v25  ;;  %914 = vmatprep.mubr.f32.mxu0 %v1638_v13 }
 0x28f   : > { %1371 = vmatmul.mubr.msk.f32.vlgmr.msra.gmra.mrb[12].mxu1 %vm377_vm1, %v1358_v23 }
 0x290   : > { %997 = vmatprep.mubr.f32.mxu1 %v1638_v13 }
 0x291   : > { %1367 = vmatmul.mubr.msk.f32.gmra.mrb[14].mxu0 %vm377_vm1, %v1359_v26 }
 0x292   : > { %920 = vmatprep.mubr.f32.mxu0 %v1638_v13 }
 0x293   : > { %1372 = vmatmul.mubr.msk.f32.gmra.mrb[14].mxu1 %vm377_vm1, %v1359_v26 }
 0x294   : > { %1003 = vmatprep.mubr.f32.mxu1 %v1638_v13 }
 0x295   : > { %1368 = vmatmul.mubr.msk.f32.gmra.mrb[16].mxu0 %vm377_vm1, %v1360_v27 }
 0x296   : > { %1128 = vmatprep.mubr.f32.mxu0 %v1638_v13 }
 0x297   : > { %1373 = vmatmul.mubr.msk.f32.gmra.mrb[16].mxu1 %vm377_vm1, %v1360_v27 }
 0x298   : > { %1207 = vmatprep.mubr.f32.mxu1 %v1638_v13 }
 0x360   : > { %v910_v29 = vpop.f32.mrb[12].mxu0 }
 0x361   : > { %v911_v30 = vadd.f32 %v910_v29, %v811_v28  ;;  %v912_v31 = vpop.f32.mrb[13].mxu0 }
 0x362   : > { %v993_v32 = vpop.f32.mrb[12].mxu1  ;;  %v913_v33 = vadd.f32 %v912_v31, %v811_v28 }
 0x363   : > { %1548 = vtanh.f32 %v911_v30  ;;  %v994_v34 = vadd.f32 %v993_v32, %v811_v28  ;;  %v995_v35 = vpop.f32.mrb[13].mxu1 }
 0x364   : > { %1550 = vtanh.f32 %v913_v33  ;;  %v996_v37 = vadd.f32 %v995_v35, %v811_v28  ;;  %v916_v44 = vpop.f32.mrb[14].mxu0 }
 0x365   : > { %1552 = vtanh.f32 %v994_v34  ;;  %v917_v41 = vadd.f32 %v916_v44, %v816_v36  ;;  %v918_v42 = vpop.f32.mrb[15].mxu0 }
 0x366   : > { %1554 = vtanh.f32 %v996_v37  ;;  %v999_v43 = vpop.f32.mrb[14].mxu1  ;;  %v919_v46 = vadd.f32 %v918_v42, %v816_v36 }
 0x367   : > { %1556 = vtanh.f32 %v917_v41  ;;  %v1000_v38 = vadd.f32 %v999_v43, %v816_v36  ;;  %v1001_v39 = vpop.f32.mrb[15].mxu1 }
 0x368   : > { %1558 = vtanh.f32 %v919_v46  ;;  %v1002_v40 = vadd.f32 %v1001_v39, %v816_v36  ;;  %v922_v45 = vpop.f32.mrb[16].mxu0 }
 0x369   : > { %1560 = vtanh.f32 %v1000_v38  ;;  %v924_v48 = vpop.f32.mrb[17].mxu0  ;;  %v923_v51 = vadd.f32 %v922_v45, %v821_v47 }
 0x36a   : > { %1562 = vtanh.f32 %v1002_v40  ;;  %v1005_v49 = vpop.f32.mrb[16].mxu1  ;;  %v925_v50 = vadd.f32 %v924_v48, %v821_v47 }
 0x36b   : > { %v1007_v52 = vpop.f32.mrb[17].mxu1  ;;  %v1006_v55 = vadd.f32 %v1005_v49, %v821_v47 }
 0x36c   : > { %1564 = vtanh.f32 %v925_v50  ;;  %v1008_v53 = vadd.f32 %v1007_v52, %v821_v47 }
 0x36d   : > { %v1549_v54 = vpop.eup %1548 }
 0x36e   : > { %v1551_v56 = vpop.eup %1550  ;;  %1566 = vtanh.f32 %v1008_v53 }
 0x36f   : > { %v1553_v57 = vpop.eup %1552  ;;  %1568 = vtanh.f32 %v923_v51 }
 0x370   : > { %v1555_v58 = vpop.eup %1554  ;;  %1570 = vtanh.f32 %v1006_v55 }
 0x371   : > { %v1557_v59 = vpop.eup %1556 }
 0x372   : > { %v1559_v60 = vpop.eup %1558  ;;  %v1422_v61 = vpack.c.bf16 %v1557_v59, %v1549_v54 }
 0x373   : > { %v1561_v62 = vpop.eup %1560  ;;  %v1420_v63 = vpack.c.bf16 %v1559_v60, %v1551_v56 }
 0x374   : > { %v1563_v0 = vpop.eup %1562  ;;  %v1426_v1 = vpack.c.bf16 %v1561_v62, %v1553_v57 }
 0x375   : > { %1421 = vmatprep.subr.bf16.mxu0 %v1420_v63  ;;  %v1424_v2 = vpack.c.bf16 %v1563_v0, %v1555_v58 }
 0x376   : > { %v1565_v3 = vpop.eup %1564  ;;  %1423 = vmatpush1.bf16.msra.mxu0 %v1422_v61 }
 0x377   : > { %1425 = vmatprep.subr.bf16.mxu1 %v1424_v2  ;;  %1380 = vmatprep.subr.msk.mxu0 %vm387_vm0, %v1565_v3 }
 0x378   : > { %v1567_v4 = vpop.eup %1566  ;;  %1427 = vmatpush1.bf16.msra.mxu1 %v1426_v1 }
 0x379   : > { %v1569_v6 = vpop.eup %1568  ;;  %1385 = vmatprep.subr.msk.mxu1 %vm387_vm0, %v1567_v4 }
 0x37a   : > { %1381 = vmatpush1.msk.msra.mxu0 %vm387_vm0, %v1569_v6  ;;  %v1571_v7 = vpop.eup %1570 }
 0x37b   : > { %1382 = vmatmul.mubr.msk.f32.vlgmr.msra.gmra.mrb[18].mxu0 %vm377_vm1, %v1374_v5 }
 0x37c   : > { %1386 = vmatpush1.msk.msra.mxu1 %vm387_vm0, %v1571_v7  ;;  %1134 = vmatprep.mubr.f32.mxu0 %v1638_v13 }
 0x37d   : > { %1387 = vmatmul.mubr.msk.f32.vlgmr.msra.gmra.mrb[18].mxu1 %vm377_vm1, %v1374_v5 }
 0x37e   : > { %1213 = vmatprep.mubr.f32.mxu1 %v1638_v13 }
 0x37f   : > { %1383 = vmatmul.mubr.msk.f32.gmra.mrb[20].mxu0 %vm377_vm1, %v1375_v8 }
 0x380   : > { %1138 = vmatprep.mubr.f32.mxu0 %v1638_v13 }
 0x381   : > { %1388 = vmatmul.mubr.msk.f32.gmra.mrb[20].mxu1 %vm377_vm1, %v1375_v8 }
 0x382   : > { %1217 = vmatprep.mubr.f32.mxu1 %v1638_v13 }
 0x383   : > { %1384 = vmatmul.mubr.msk.f32.gmra.mrb[22].mxu0 %vm377_vm1, %v1376_v9 }
 0x385   : > { %1389 = vmatmul.mubr.msk.f32.gmra.mrb[22].mxu1 %vm377_vm1, %v1376_v9 }
 0x44e   : > { %v1130_v15 = vpop.f32.mrb[18].mxu0 }
 0x44f   : > { %v1131_v16 = vadd.f32 %v1130_v15, %v1033_v14  ;;  %v1132_v17 = vpop.f32.mrb[19].mxu0 }
 0x450   : > { %v1209_v18 = vpop.f32.mrb[18].mxu1  ;;  %v1133_v19 = vadd.f32 %v1132_v17, %v1033_v14 }
 0x451   : > { %v1210_v13 = vadd.f32 %v1209_v18, %v1033_v14  ;;  %v1211_v22 = vpop.f32.mrb[19].mxu1 }
 0x452   : > { %v1226_v23 = vcombine.low %v1131_v16, %v1133_v19  ;;  %v1212_v24 = vadd.f32 %v1211_v22, %v1033_v14  ;;  %v1136_v25 = vpop.f32.mrb[20].mxu0 }
 0x453   : > { %v1137_v26 = vpop.f32.mrb[21].mxu0 }
 0x454   : > { %v1234_v27 = vrot.slane %v1226_v23, %v1233_v21  ;;  %v1227_v28 = vcombine.low %v1210_v13, %v1212_v24  ;;  %v1215_v29 = vpop.f32.mrb[20].mxu1 }
 0x455   : > { %v1216_v30 = vpop.f32.mrb[21].mxu1 }
 0x456   : > { %v1241_v31 = vrot.slane %v1227_v28, %v1233_v21  ;;  %v1140_v32 = vpop.f32.mrb[22].mxu0 }
 0x457   : > { %v1141_v33 = vpop.f32.mrb[23].mxu0 }
 0x458   : > { %v1219_v34 = vpop.f32.mrb[22].mxu1  ;;  %v1242_v20 = vcombine.low %v1234_v27, %v1241_v31 }
 0x459   : > { %v1220_v35 = vpop.f32.mrb[23].mxu1 }
 0x45a   : > { %1244 = vst [vmem:[%s164_s7] sm:$0xff] %v1242_v20 }
 0x45b   : > { %1585 = shalt.err (!%p1582_p3)
}
 0x45c   : > { %s1586_s25 = scalar_lea.hbm %s1879_s11, 128  ;;  %s1590_s28 = scalar_lea.hbm %s1926_s3, 256 }
 0x45d   : > { %p1587_p4 = scmp.ne.s32.totalorder %s1879_s11, %s1586_s25  ;;  %p1591_p9 = scmp.lt.u32.totalorder %s1879_s11, %s1926_s3 }
 0x45e   : > { %p1592_p10 = scmp.lt.u32.totalorder %s1590_s28, %s1586_s25  ;;  %p1594_p12 = scmp.lt.u32.totalorder %s1586_s25, %s1879_s11 }
 0x45f   : > { %p1588_p7 = pnand %p1587_p4, %p1699_p5 }
 0x460   : > { %p1593_p11 = por %p1592_p10, %p1591_p9 }
 0x461   : > { %p1589_p8 = pneg %p1588_p7 }
 0x462   : > { %p1595_p13 = por %p1594_p12, %p1593_p11 }
 0x464   : > { %p1596_p0 = pnand %p1595_p13, %p1589_p8 }
 0x466   : > { %1599 = shalt.err (!%p1596_p0)
}
 0x467   : > { %1428 = dma.vmem_to_hbm [thread:$0]  (%p1699_p5), %s1881_s8, 128, %s1879_s11, %s1246_s16  }
 0x468 PF: > { %p1434_p1 = scmp.ge.s32.totalorder %s1634_s15, 2  ;;  %s1272_s4 = sand.u32 1, %s1622_s12  }
 0x469   : > { %s1273_s5 = scalar_lea.sflag [#allocation3], %s1272_s4 }
 0x46a   : > { %p1431_p2 = pnand %p1434_p1, %p1703_p6 }
 0x46c   : > { %1617 = dma.done.wait (!%p1431_p2), %s1273_s5, 128  }
 0x46d   : > { %1619 = vsyncadd (!%p1431_p2), %s1273_s5, 4294967168  ;;  %p13_p3 = scmp.ge.s32.totalorder %s1686_s18, 4   ;;  %s1929_s12 = smov %s1626_s13 }
 0x46e   : > { %s1930_s13 = smov %s1630_s14  ;;  %s1931_s14 = smov %s1697_s21 }
 0x46f   : > { %s1932_s15 = smov %s1686_s18  ;;  %15 = sbr.rel (!%p13_p3) target bundleno = 3 (0x3), region = 75 }
 0x476   :  { %1278 = vsyncpa [#allocation3], 1 }
 0x477   :  { %1280 = vsyncpa [#allocation3 + $0x1], 1 }

</bundles_post_ra>
